<compile_context>
chip_gen: v6e
topology: v6e:2x2x1
jax: 0.10.0
libtpu: 0.0.40
codegen_flags: <defaults>
</compile_context>

<pallas_src>
import jax
import jax.numpy as jnp
from jax.experimental import pallas as pl
from jax.experimental.pallas import tpu as pltpu

_LANE = 128    # TPU lane width
_SUBLANE = 8   # TPU sublane width


def _round_up(v, m):
    return ((v + m - 1) // m) * m


def policy_kernel(xt_ref, w1t_ref, b1_ref, wh_ref, bh_ref, out_ref):
    """One batch tile, transposed layout (batch along lanes).

    xt_ref : (K, tb)   observations^T, K=8 features on sublanes, batch on lanes
    w1t_ref: (H, K)    hidden-layer weight (transposed), H=128   [resident]
    b1_ref : (H, 1)    hidden bias as a column                   [resident]
    wh_ref : (P, H)    fused actor+critic head weight, P=8:
                       rows 0..3 actor, row 4 critic, rows 5..7 zero pad
    bh_ref : (P, 1)    fused head bias column
    out_ref: (P, tb)   fused transposed output (lane-dense store)
    """
    # h^T = relu(W1^T @ x^T + b1):  (H, K) @ (K, tb) -> (H, tb)
    ht = jnp.dot(w1t_ref[...], xt_ref[...], preferred_element_type=jnp.float32)
    ht = jnp.maximum(ht + b1_ref[...], 0.0)

    # Fused narrow head:  (P, H) @ (H, tb) -> (P, tb).  Only 5 of the 8 rows
    # are useful, but the store stays lane-dense (last dim = tb >= 128) and
    # the head MXU work is 16x smaller than a (tb,128)@(128,128) formulation.
    out = jnp.dot(wh_ref[...], ht, preferred_element_type=jnp.float32)
    out_ref[...] = out + bh_ref[...]


def fuse_policy_params(w1, b1, wa, ba, wv, bv):
    """Pre-pack parameters for the transposed kernel.  Call ONCE at init time.

    w1: (8, 128), b1: (128,), wa: (128, 4), ba: (4,), wv: (128, 1), bv: (1,)
    (PyTorch weights are (out, in); these are already transposed to (in, out).)
    Returns (w1t (128,8), b1c (128,1), wh (8,128), bh (8,1), n_actions, n_values).
    """
    H = w1.shape[1]
    n_a = wa.shape[1]
    n_v = wv.shape[1]
    p = _round_up(max(n_a + n_v, _SUBLANE), _SUBLANE)   # pad head rows to 8

    w1t = jnp.asarray(w1, jnp.float32).T                # (H, K)
    b1c = jnp.asarray(b1, jnp.float32).reshape(H, 1)    # (H, 1)

    wh = jnp.zeros((p, H), jnp.float32)
    wh = wh.at[:n_a, :].set(wa.T).at[n_a:n_a + n_v, :].set(wv.T)
    bh = jnp.zeros((p, 1), jnp.float32)
    bh = bh.at[:n_a, 0].set(ba).at[n_a:n_a + n_v, 0].set(bv)
    return w1t, b1c, wh, bh, n_a, n_v


def policy_forward(x, w1t, b1c, wh, bh, *, n_actions=4, n_values=1,
                   block_b=4096):
    """x: (B, 8) float32; fused params from fuse_policy_params().
    Returns (action_logits (B, n_actions), state_values (B, n_values))."""
    B, K = x.shape
    H = w1t.shape[0]          # 128 hidden units
    P = wh.shape[0]           # 8 padded head rows

    # ---- Batch tile: multiple of 128 lanes (lane-dense x^T / out^T blocks),
    # large enough to amortize the ~0.35us per-grid-step overhead, but capped
    # so big batches get >= 2 grid steps for v7x megacore sharding.
    b_lane = _round_up(B, _LANE)
    tb = min(_round_up(block_b, _LANE), b_lane)
    if b_lane >= 2 * _LANE:
        tb = min(tb, _round_up(pl.cdiv(b_lane, 2), _LANE))
    tb = max(tb, _LANE)
    b_pad = _round_up(B, tb)

    # Transposed input: batch along lanes -> 8 x B_pad lane-dense slab.
    xt = jnp.asarray(x, jnp.float32).T                  # (K, B)
    if b_pad != B:
        xt = jnp.pad(xt, ((0, 0), (0, b_pad - B)))

    grid = (b_pad // tb,)

    out_t = pl.pallas_call(
        policy_kernel,
        out_shape=jax.ShapeDtypeStruct((P, b_pad), jnp.float32),
        grid=grid,
        in_specs=[
            pl.BlockSpec((K, tb), lambda i: (0, i)),    # x^T: tiled over batch
            pl.BlockSpec((H, K), lambda i: (0, 0)),     # W1^T: resident
            pl.BlockSpec((H, 1), lambda i: (0, 0)),     # b1 column: resident
            pl.BlockSpec((P, H), lambda i: (0, 0)),     # fused head weight
            pl.BlockSpec((P, 1), lambda i: (0, 0)),     # fused head bias
        ],
        out_specs=pl.BlockSpec((P, tb), lambda i: (0, i)),
        compiler_params=pltpu.CompilerParams(
            dimension_semantics=("parallel",)),
    )(xt, w1t, b1c, wh, bh)

    # One small slice of the (P, B_pad) output, then split the two heads.
    head_t = jax.lax.slice(out_t, (0, 0), (n_actions + n_values, B))
    action_logits = head_t[:n_actions, :].T                       # (B, 4)
    state_values = head_t[n_actions:n_actions + n_values, :].T    # (B, 1)
    return action_logits, state_values


def init_params(key):
    """Deterministic synthetic parameters matching nn.Linear shapes
    (kept transposed to (in, out) relative to PyTorch's (out, in))."""
    k1, k2, k3, k4, k5, k6 = jax.random.split(key, 6)
    w1 = jax.random.normal(k1, (8, 128), jnp.float32) * 0.1    # affine1.weight.T
    b1 = jax.random.normal(k2, (128,), jnp.float32) * 0.1      # affine1.bias
    wa = jax.random.normal(k3, (128, 4), jnp.float32) * 0.1    # action_head.weight.T
    ba = jax.random.normal(k4, (4,), jnp.float32) * 0.1        # action_head.bias
    wv = jax.random.normal(k5, (128, 1), jnp.float32) * 0.1    # value_head.weight.T
    bv = jax.random.normal(k6, (1,), jnp.float32) * 0.1        # value_head.bias
    return w1, b1, wa, ba, wv, bv


if __name__ == "__main__":
    key = jax.random.PRNGKey(0)
    kx, kp = jax.random.split(key)

    B = 2  # small batch of 8-dim observations (LunarLander-style state)
    x = jax.random.normal(kx, (B, 8), jnp.float32)
    w1, b1, wa, ba, wv, bv = init_params(kp)

    # Parameter fusion / transposition hoisted out of the per-call path.
    w1t, b1c, wh, bh, n_a, n_v = fuse_policy_params(w1, b1, wa, ba, wv, bv)
    jax.block_until_ready((w1t, b1c, wh, bh))

    logits, values = policy_forward(x, w1t, b1c, wh, bh,
                                    n_actions=n_a, n_values=n_v)
    jax.block_until_ready((logits, values))

    # Pure-JAX reference (identical math to the nn.Module forward).
    h_ref = jnp.maximum(x @ w1 + b1, 0.0)
    logits_ref = h_ref @ wa + ba
    values_ref = h_ref @ wv + bv
    assert logits.shape == (B, 4) and values.shape == (B, 1)
    assert jnp.allclose(logits, logits_ref, atol=1e-5)
    assert jnp.allclose(values, values_ref, atol=1e-5)

    # Larger batch spanning multiple grid steps (exercises tiling + padding +
    # the >=2-step megacore split).
    B2 = 1000
    x2 = jax.random.normal(jax.random.PRNGKey(7), (B2, 8), jnp.float32)
    logits2, values2 = policy_forward(x2, w1t, b1c, wh, bh,
                                      n_actions=n_a, n_values=n_v)
    jax.block_until_ready((logits2, values2))
    h2 = jnp.maximum(x2 @ w1 + b1, 0.0)
    assert logits2.shape == (B2, 4) and values2.shape == (B2, 1)
    assert jnp.allclose(logits2, h2 @ wa + ba, atol=1e-4)
    assert jnp.allclose(values2, h2 @ wv + bv, atol=1e-4)

    print("KERNEL_OK")
</pallas_src>

<mosaic_0001>
module attributes {stable_mosaic.version = 11 : i64} {
  func.func @policy_kernel(%arg0: i32, %arg1: memref<8x128xf32, #tpu.memory_space<vmem>>, %arg2: memref<128x8xf32, #tpu.memory_space<vmem>>, %arg3: memref<128x1xf32, #tpu.memory_space<vmem>>, %arg4: memref<8x128xf32, #tpu.memory_space<vmem>>, %arg5: memref<8x1xf32, #tpu.memory_space<vmem>>, %arg6: memref<8x128xf32, #tpu.memory_space<vmem>>) attributes {dimension_semantics = [#tpu.dimension_semantics<parallel>], iteration_bounds = array<i64: 1>, scalar_prefetch = 0 : i64, scratch_operands = 0 : i64, tpu.core_type = #tpu.core_type<tc>, window_params = [{transform_indices = @transform_0, window_bounds = array<i64: 8, 128>}, {pipeline_mode = #tpu.pipeline_mode<synchronous>, transform_indices = @transform_1, window_bounds = array<i64: 128, 8>}, {pipeline_mode = #tpu.pipeline_mode<synchronous>, transform_indices = @transform_2, window_bounds = array<i64: 128, 1>}, {pipeline_mode = #tpu.pipeline_mode<synchronous>, transform_indices = @transform_3, window_bounds = array<i64: 8, 128>}, {pipeline_mode = #tpu.pipeline_mode<synchronous>, transform_indices = @transform_4, window_bounds = array<i64: 8, 1>}, {transform_indices = @transform_5, window_bounds = array<i64: 8, 128>}]} {
    %c0 = arith.constant 0 : index
    %c0_0 = arith.constant 0 : index
    %0 = vector.load %arg2[%c0, %c0_0] : memref<128x8xf32, #tpu.memory_space<vmem>>, vector<128x8xf32>
    %c0_1 = arith.constant 0 : index
    %c0_2 = arith.constant 0 : index
    %1 = vector.load %arg1[%c0_1, %c0_2] : memref<8x128xf32, #tpu.memory_space<vmem>>, vector<8x128xf32>
    %cst = arith.constant dense<0.000000e+00> : vector<128x128xf32>
    %2 = tpu.matmul %0, %1, %cst {dimension_numbers = #tpu.dot_dimension_numbers<[1], [0], [0], [1], [0, 0, 1, 1], [], []>} : vector<128x8xf32>, vector<8x128xf32>, vector<128x128xf32> -> vector<128x128xf32>
    %c0_3 = arith.constant 0 : index
    %c0_4 = arith.constant 0 : index
    %3 = vector.load %arg3[%c0_3, %c0_4] : memref<128x1xf32, #tpu.memory_space<vmem>>, vector<128x1xf32>
    %4 = vector.broadcast %3 : vector<128x1xf32> to vector<128x128xf32>
    %5 = arith.addf %2, %4 : vector<128x128xf32>
    %cst_5 = arith.constant 0.000000e+00 : f32
    %6 = vector.broadcast %cst_5 : f32 to vector<128x128xf32>
    %7 = arith.maximumf %5, %6 : vector<128x128xf32>
    %c0_6 = arith.constant 0 : index
    %c0_7 = arith.constant 0 : index
    %8 = vector.load %arg4[%c0_6, %c0_7] : memref<8x128xf32, #tpu.memory_space<vmem>>, vector<8x128xf32>
    %cst_8 = arith.constant dense<0.000000e+00> : vector<8x128xf32>
    %9 = tpu.matmul %8, %7, %cst_8 {dimension_numbers = #tpu.dot_dimension_numbers<[1], [0], [0], [1], [0, 0, 1, 1], [], []>} : vector<8x128xf32>, vector<128x128xf32>, vector<8x128xf32> -> vector<8x128xf32>
    %c0_9 = arith.constant 0 : index
    %c0_10 = arith.constant 0 : index
    %10 = vector.load %arg5[%c0_9, %c0_10] : memref<8x1xf32, #tpu.memory_space<vmem>>, vector<8x1xf32>
    %11 = vector.broadcast %10 : vector<8x1xf32> to vector<8x128xf32>
    %12 = arith.addf %9, %11 : vector<8x128xf32>
    %c0_11 = arith.constant 0 : index
    %c0_12 = arith.constant 0 : index
    %13 = vector.load %arg6[%c0_11, %c0_12] : memref<8x128xf32, #tpu.memory_space<vmem>>, vector<8x128xf32>
    tpu.vector_store %arg6[%c0_11, %c0_12], %12 {strides = array<i32>} : memref<8x128xf32, #tpu.memory_space<vmem>>, vector<8x128xf32>,
    return
  }
  func.func @transform_0(%arg0: i32) -> (i32, i32) {
    %c0_i32 = arith.constant 0 : i32
    %c0_i32_0 = arith.constant 0 : i32
    return %c0_i32, %arg0 : i32, i32
  }
  func.func @transform_1(%arg0: i32) -> (i32, i32) {
    %c0_i32 = arith.constant 0 : i32
    %c0_i32_0 = arith.constant 0 : i32
    %c0_i32_1 = arith.constant 0 : i32
    return %c0_i32, %c0_i32_0 : i32, i32
  }
  func.func @transform_2(%arg0: i32) -> (i32, i32) {
    %c0_i32 = arith.constant 0 : i32
    %c0_i32_0 = arith.constant 0 : i32
    %c0_i32_1 = arith.constant 0 : i32
    return %c0_i32, %c0_i32_0 : i32, i32
  }
  func.func @transform_3(%arg0: i32) -> (i32, i32) {
    %c0_i32 = arith.constant 0 : i32
    %c0_i32_0 = arith.constant 0 : i32
    %c0_i32_1 = arith.constant 0 : i32
    return %c0_i32, %c0_i32_0 : i32, i32
  }
  func.func @transform_4(%arg0: i32) -> (i32, i32) {
    %c0_i32 = arith.constant 0 : i32
    %c0_i32_0 = arith.constant 0 : i32
    %c0_i32_1 = arith.constant 0 : i32
    return %c0_i32, %c0_i32_0 : i32, i32
  }
  func.func @transform_5(%arg0: i32) -> (i32, i32) {
    %c0_i32 = arith.constant 0 : i32
    %c0_i32_0 = arith.constant 0 : i32
    return %c0_i32, %arg0 : i32, i32
  }
}

</mosaic_0001>

<bundles_post_ra>
// kernel: tpu_custom_call.1
= control target key start
LH: loop header
LB: loop body
LE: loop exit
PB: predicated region body
PF: predicated region fallthrough
CT: control target
= control target key end

     0   :  { %vm134_vm0 = vcmask 64512   ;;  %v575_v4 = vmov 0   ;;  %s762_s0 = inlined_call_operand.vmem [shape: f32[8,128], index: 0, kind: input, shape index: {}]   ;;  %s763_s1 = inlined_call_operand.vmem [shape: f32[128,8], index: 1, kind: input, shape index: {}]   ;;  %s764_s2 = inlined_call_operand.vmem [shape: f32[128,1], index: 2, kind: input, shape index: {}]   ;;  %s765_s3 = inlined_call_operand.vmem [shape: f32[8,128], index: 3, kind: input, shape index: {}]   ;;  %s766_s4 = inlined_call_operand.vmem [shape: f32[8,1], index: 4, kind: input, shape index: {}]   ;;  %s767_s5 = inlined_call_operand.hbm [shape: f32[8,128], index: 5, kind: output, shape index: {}]  }
   0x1   :  { %v37_v0 = vld [vmem:[%s762_s0] sm:$0xff]  ;;  %v22_v2 = vld [vmem:[%s763_s1 + $0x8] sm:$0xff]  ;;  %v23_v3 = vld [vmem:[%s763_s1 + $0x10] sm:$0xff]  ;;  %551 = vset.pattern.permute.xlu0 %v575_v4  ;;  %552 = vset.pattern.permute.xlu1 %v575_v4 }
   0x2   :  { %v21_v1 = vld [vmem:[%s763_s1] sm:$0xff]  ;;  %486 = vmatprep.subr.mxu0 %v37_v0  ;;  %v24_v5 = vld [vmem:[%s763_s1 + $0x18] sm:$0xff]  ;;  %v51_v8 = vld [vmem:[%s764_s2 + $0x68] sm:$0xff] }
   0x3   :  { %488 = vmatprep.mubr.msk.f32.mxu0 %vm134_vm0, %v21_v1  ;;  %487 = vmatpush3.msra.mxu0 %v37_v0  ;;  %v25_v6 = vld [vmem:[%s763_s1 + $0x20] sm:$0xff]  ;;  %v53_v7 = vld [vmem:[%s764_s2 + $0x78] sm:$0xff]  ;;  %v52_v9 = vld [vmem:[%s764_s2 + $0x70] sm:$0xff] }
   0x4   :  { %489 = vmatmul.mubr.msk.f32.vlgmr.msra.gmra.mxu0 %vm134_vm0, %v22_v2  ;;  %131 = vperm.xlu0 %551, %v53_v7   ;;  %v26_v10 = vld [vmem:[%s763_s1 + $0x28] sm:$0xff]  ;;  %v50_v11 = vld [vmem:[%s764_s2 + $0x60] sm:$0xff]  ;;  %v27_v12 = vld [vmem:[%s763_s1 + $0x30] sm:$0xff] }
   0x5   :  { %491 = vmatprep.mubr.msk.f32.mxu0 %vm134_vm0, %v23_v3  ;;  %121 = vperm.xlu1 %552, %v51_v8   ;;  %v49_v13 = vld [vmem:[%s764_s2 + $0x58] sm:$0xff] }
   0x8   :  { %492 = vmatmul.mubr.msk.f32.gmra.mxu0 %vm134_vm0, %v24_v5  ;;  %126 = vperm.xlu0 %551, %v52_v9  }
   0x9   :  { %494 = vmatprep.mubr.msk.f32.mxu0 %vm134_vm0, %v25_v6  ;;  %116 = vperm.xlu1 %552, %v50_v11  }
   0xc   :  { %495 = vmatmul.mubr.msk.f32.gmra.mxu0 %vm134_vm0, %v26_v10 }
   0xd   :  { %10 = vsyncpa [#allocation3], 0  ;;  %497 = vmatprep.mubr.msk.f32.mxu0 %vm134_vm0, %v27_v12  ;;  %v28_v14 = vld [vmem:[%s763_s1 + $0x38] sm:$0xff]  ;;  %v48_v15 = vld [vmem:[%s764_s2 + $0x50] sm:$0xff]  ;;  %111 = vperm.xlu0 %551, %v49_v13   ;;  %v576_v35 = vmov 0.0   ;;  %vm577_vm1 = vmmov 0  }
   0xe   :  { %v29_v16 = vld [vmem:[%s763_s1 + $0x40] sm:$0xff]  ;;  %106 = vperm.xlu1 %552, %v48_v15   ;;  %v47_v17 = vld [vmem:[%s764_s2 + $0x48] sm:$0xff]  ;;  %v31_v20 = vld [vmem:[%s763_s1 + $0x50] sm:$0xff]  ;;  %512 = vmatprep.subr.mxu1 %v576_v35  ;;  %s578_s7 = smov [#allocation2]  }
   0xf   :  { %v30_v18 = vld [vmem:[%s763_s1 + $0x48] sm:$0xff]  ;;  %v46_v19 = vld [vmem:[%s764_s2 + $0x40] sm:$0xff]  ;;  %v45_v21 = vld [vmem:[%s764_s2 + $0x38] sm:$0xff]  ;;  %544 = vmatprep.mubr.msk.f32.mxu1 %vm577_vm1, %v576_v35  ;;  %s428_s8 = sshll.u32 %s578_s7, 4  ;;  %s429_s8 = int_to_ptr.vmem [resolvable:$true] %s428_s8 }
  0x10   :  { %498 = vmatmul.mubr.msk.f32.gmra.mxu0 %vm134_vm0, %v28_v14  ;;  %v32_v22 = vld [vmem:[%s763_s1 + $0x58] sm:$0xff]  ;;  %v44_v23 = vld [vmem:[%s764_s2 + $0x30] sm:$0xff]  ;;  %v33_v24 = vld [vmem:[%s763_s1 + $0x60] sm:$0xff]  ;;  %s553_s9 = scalar_lea.vmem %s429_s8, 128  ;;  %p558_p1 = scmp.lt.s32.totalorder %s429_s8, %s429_s8 }
  0x11   :  { %500 = vmatprep.mubr.msk.f32.mxu0 %vm134_vm0, %v29_v16  ;;  %101 = vperm.xlu0 %551, %v47_v17   ;;  %v43_v25 = vld [vmem:[%s764_s2 + $0x28] sm:$0xff]  ;;  %v42_v27 = vld [vmem:[%s764_s2 + $0x20] sm:$0xff]  ;;  %v35_v28 = vld [vmem:[%s763_s1 + $0x70] sm:$0xff]  ;;  %p554_p0 = scmp.ne.s32.totalorder %s429_s8, %s553_s9  ;;  %p559_p2 = scmp.lt.s32.totalorder %s553_s9, %s553_s9 }
  0x12   :  { %96 = vperm.xlu1 %552, %v46_v19   ;;  %v34_v26 = vld [vmem:[%s763_s1 + $0x68] sm:$0xff]  ;;  %v41_v29 = vld [vmem:[%s764_s2 + $0x18] sm:$0xff]  ;;  %v40_v31 = vld [vmem:[%s764_s2 + $0x10] sm:$0xff] }
  0x13   :  { %v36_v30 = vld [vmem:[%s763_s1 + $0x78] sm:$0xff]  ;;  %v39_v32 = vld [vmem:[%s764_s2 + $0x8] sm:$0xff]  ;;  %v38_v33 = vld [vmem:[%s764_s2] sm:$0xff]  ;;  %p560_p3 = por %p559_p2, %p558_p1 }
  0x14   :  { %501 = vmatmul.mubr.msk.f32.gmra.mxu0 %vm134_vm0, %v30_v18  ;;  %v345_v34 = vld [vmem:[%s766_s4] sm:$0xff] }
  0x15   :  { %503 = vmatprep.mubr.msk.f32.mxu0 %vm134_vm0, %v31_v20  ;;  %91 = vperm.xlu0 %551, %v45_v21   ;;  %p561_p4 = pnand %p560_p3, %p554_p0 }
  0x16   :  { %86 = vperm.xlu1 %552, %v44_v23  }
  0x18   :  { %504 = vmatmul.mubr.msk.f32.gmra.mxu0 %vm134_vm0, %v32_v22 }
  0x19   :  { %506 = vmatprep.mubr.msk.f32.mxu0 %vm134_vm0, %v33_v24  ;;  %81 = vperm.xlu0 %551, %v43_v25  }
  0x1a   :  { %76 = vperm.xlu1 %552, %v42_v27  }
  0x1c   :  { %507 = vmatmul.mubr.msk.f32.gmra.mxu0 %vm134_vm0, %v34_v26 }
  0x1d   :  { %509 = vmatprep.mubr.msk.f32.mxu0 %vm134_vm0, %v35_v28  ;;  %71 = vperm.xlu0 %551, %v41_v29  }
  0x1e   :  { %66 = vperm.xlu1 %552, %v40_v31  }
  0x20   :  { %510 = vmatmul.mubr.msk.f32.gmra.mxu0 %vm134_vm0, %v36_v30 }
  0x21   :  { %61 = vperm.xlu0 %551, %v39_v32  }
  0x22   :  { %56 = vperm.xlu1 %552, %v38_v33  }
  0x25   :  { %348 = vperm.xlu0 %551, %v345_v34  }
  0x7f   :  { %v132_v41 = vpop.permute.xlu0 %131 }
  0x80   :  { %v122_v43 = vpop.permute.xlu1 %121 }
  0x83   :  { %v127_v46 = vpop.permute.xlu0 %126 }
  0x84   :  { %v117_v48 = vpop.permute.xlu1 %116 }
  0x88   :  { %v112_v51 = vpop.permute.xlu0 %111 }
  0x89   :  { %v107_v53 = vpop.permute.xlu1 %106 }
  0x8c   :  { %v102_v56 = vpop.permute.xlu0 %101 }
  0x8d   :  { %v97_v59 = vpop.permute.xlu1 %96 }
  0x90   :  { %v92_v2 = vpop.permute.xlu0 %91 }
  0x91   :  { %v87_v5 = vpop.permute.xlu1 %86 }
  0x94   :  { %v82_v10 = vpop.permute.xlu0 %81 }
  0x95   :  { %v77_v13 = vpop.permute.xlu1 %76 }
  0x98   :  { %v72_v18 = vpop.permute.xlu0 %71 }
  0x99   :  { %v67_v21 = vpop.permute.xlu1 %66 }
  0x9c   :  { %v62_v26 = vpop.permute.xlu0 %61 }
  0x9d   :  { %v57_v29 = vpop.permute.xlu1 %56 }
  0xc4   :  { %v729_v36 = vpop.f32.mrf.mxu0 }
  0xc5   :  { %v255_v30 = vadd.f32 %v729_v36, %v62_v26  ;;  %v344_v36 = vld [vmem:[%s765_s3] sm:$0xff] }
  0xc6   :  { %v731_v37 = vpop.f32.mrf.mxu0 }
  0xc7   :  { %v250_v32 = vadd.f32 %v731_v37, %v57_v29  ;;  %v329_v34 = vmax.f32 %v255_v30, 0.0  ;;  %v349_v37 = vpop.permute.xlu0 %348 }
  0xc8   :  { %v733_v38 = vpop.f32.mrf.mxu0 }
  0xc9   :  { %v265_v24 = vadd.f32 %v733_v38, %v72_v18  ;;  %v328_v38 = vmax.f32 %v250_v32, 0.0 }
  0xca   :  { %v735_v39 = vpop.f32.mrf.mxu0 }
  0xcb   :  { %v260_v27 = vadd.f32 %v735_v39, %v67_v21  ;;  %v331_v31 = vmax.f32 %v265_v24, 0.0 }
  0xcc   :  { %v496_v40 = vpop.f32.mrf.mxu0 }
  0xcd   :  { %v275_v19 = vadd.f32 %v496_v40, %v82_v10  ;;  %v330_v33 = vmax.f32 %v260_v27, 0.0 }
  0xce   :  { %v269_v42 = vpop.f32.mrf.mxu0 }
  0xcf   :  { %v270_v22 = vadd.f32 %v269_v42, %v77_v13  ;;  %v333_v25 = vmax.f32 %v275_v19, 0.0 }
  0xd0   :  { %v499_v44 = vpop.f32.mrf.mxu0 }
  0xd1   :  { %v285_v14 = vadd.f32 %v499_v44, %v92_v2  ;;  %v332_v28 = vmax.f32 %v270_v22, 0.0 }
  0xd2   :  { %v279_v45 = vpop.f32.mrf.mxu0 }
  0xd3   :  { %v280_v16 = vadd.f32 %v279_v45, %v87_v5  ;;  %v335_v20 = vmax.f32 %v285_v14, 0.0 }
  0xd4   :  { %v502_v47 = vpop.f32.mrf.mxu0 }
  0xd5   :  { %v295_v8 = vadd.f32 %v502_v47, %v102_v56  ;;  %v334_v23 = vmax.f32 %v280_v16, 0.0 }
  0xd6   :  { %v289_v49 = vpop.f32.mrf.mxu0 }
  0xd7   :  { %v290_v11 = vadd.f32 %v289_v49, %v97_v59  ;;  %v337_v15 = vmax.f32 %v295_v8, 0.0 }
  0xd8   :  { %v505_v50 = vpop.f32.mrf.mxu0 }
  0xd9   :  { %v305_v3 = vadd.f32 %v505_v50, %v112_v51  ;;  %v336_v17 = vmax.f32 %v290_v11, 0.0 }
  0xda   :  { %v299_v52 = vpop.f32.mrf.mxu0 }
  0xdb   :  { %v300_v6 = vadd.f32 %v299_v52, %v107_v53  ;;  %v339_v9 = vmax.f32 %v305_v3, 0.0 }
  0xdc   :  { %v508_v54 = vpop.f32.mrf.mxu0 }
  0xdd   :  { %v315_v61 = vadd.f32 %v508_v54, %v122_v43  ;;  %v338_v12 = vmax.f32 %v300_v6, 0.0 }
  0xde   :  { %v309_v55 = vpop.f32.mrf.mxu0 }
  0xdf   :  { %v310_v0 = vadd.f32 %v309_v55, %v117_v48  ;;  %v341_v4 = vmax.f32 %v315_v61, 0.0 }
  0xe0   :  { %v511_v57 = vpop.f32.mrf.mxu0 }
  0xe1   :  { %v325_v58 = vadd.f32 %v511_v57, %v132_v41  ;;  %v340_v7 = vmax.f32 %v310_v0, 0.0 }
  0xe2   :  { %v319_v60 = vpop.f32.mrf.mxu0 }
  0xe3   :  { %v343_v62 = vmax.f32 %v325_v58, 0.0  ;;  %v320_v63 = vadd.f32 %v319_v60, %v127_v46 }
  0xe5   :  { %v342_v1 = vmax.f32 %v320_v63, 0.0  ;;  %513 = vmatpush3.msra.mxu1 %v343_v62 }
  0xe6   :  { %514 = vmatprep.subr.mxu1 %v576_v35 }
  0xe7   :  { %515 = vmatpush3.msra.mxu1 %v342_v1 }
  0xe8   :  { %516 = vmatprep.subr.mxu1 %v576_v35 }
  0xe9   :  { %517 = vmatpush3.msra.mxu1 %v341_v4 }
  0xea   :  { %518 = vmatprep.subr.mxu1 %v576_v35 }
  0xeb   :  { %519 = vmatpush3.msra.mxu1 %v340_v7 }
  0xec   :  { %520 = vmatprep.subr.mxu1 %v576_v35 }
  0xed   :  { %521 = vmatpush3.msra.mxu1 %v339_v9 }
  0xee   :  { %522 = vmatprep.subr.mxu1 %v576_v35 }
  0xef   :  { %523 = vmatpush3.msra.mxu1 %v338_v12 }
  0xf0   :  { %524 = vmatprep.subr.mxu1 %v576_v35 }
  0xf1   :  { %525 = vmatpush3.msra.mxu1 %v337_v15 }
  0xf2   :  { %526 = vmatprep.subr.mxu1 %v576_v35 }
  0xf3   :  { %527 = vmatpush3.msra.mxu1 %v336_v17 }
  0xf4   :  { %528 = vmatprep.subr.mxu1 %v576_v35 }
  0xf5   :  { %529 = vmatpush3.msra.mxu1 %v335_v20 }
  0xf6   :  { %530 = vmatprep.subr.mxu1 %v576_v35 }
  0xf7   :  { %531 = vmatpush3.msra.mxu1 %v334_v23 }
  0xf8   :  { %532 = vmatprep.subr.mxu1 %v576_v35 }
  0xf9   :  { %533 = vmatpush3.msra.mxu1 %v333_v25 }
  0xfa   :  { %534 = vmatprep.subr.mxu1 %v576_v35 }
  0xfb   :  { %535 = vmatpush3.msra.mxu1 %v332_v28 }
  0xfc   :  { %536 = vmatprep.subr.mxu1 %v576_v35 }
  0xfd   :  { %537 = vmatpush3.msra.mxu1 %v331_v31 }
  0xfe   :  { %538 = vmatprep.subr.mxu1 %v576_v35 }
  0xff   :  { %539 = vmatpush3.msra.mxu1 %v330_v33 }
 0x100   :  { %540 = vmatprep.subr.mxu1 %v576_v35 }
 0x101   :  { %541 = vmatpush3.msra.mxu1 %v329_v34 }
 0x102   :  { %542 = vmatprep.subr.mxu1 %v576_v35 }
 0x103   :  { %543 = vmatpush3.msra.mxu1 %v328_v38 }
 0x104   :  { %545 = vmatmul.mubr.f32.vlgmr.msra.gmra.mxu1 %v344_v36 }
 0x1c4   :  { %v417_v39 = vpop.f32.mrf.mxu1 }
 0x1c5   :  { %v418_v40 = vadd.f32 %v417_v39, %v349_v37 }
 0x1c6   :  { %v546_v41 = vpop.f32.mrf.mxu1 }
 0x1c7   :  { %421 = vst [vmem:[#allocation2] sm:$0xff] %v418_v40 }
 0x1c8   :  { %564 = shalt.err (!%p561_p4)
}
 0x1c9   :  { %431 = dma.vmem_to_hbm [thread:$0]  %s429_s8, 128, %s767_s5, [#allocation3]  }
 0x1ca   :  { %573 = dma.done.wait [#allocation3], 128  }
 0x1cb   :  { %574 = vsyncadd [#allocation3], 4294967168 }
 0x1cc   :  { %435 = vsyncpa [#allocation3], 1 }

</bundles_post_ra>
